<compile_context>
chip_gen: v7x
topology: tpu7x:2x2x1
jax: 0.10.0
libtpu: 0.0.40
codegen_flags: <defaults>
</compile_context>

<pallas_src>
import jax
import jax.numpy as jnp
from jax.experimental import pallas as pl
from jax.experimental.pallas import tpu as pltpu

EMBED_DIM = 50
NUM_CONV_LAYERS = 5      # the `for _ in range(5)` residual gated conv stack
C_PAD = 128              # padded channel dim (>= EMBED_DIM)
K_PAD = 128              # padded tag-logit dim (>= num_tags)
NEXT_LANE_OFF = 64       # lane offset of the "next" tap inside the packed group
assert EMBED_DIM <= NEXT_LANE_OFF and NEXT_LANE_OFF + EMBED_DIM <= C_PAD


# ----------------------------- Pallas kernel ------------------------------- #
def _make_emission_kernel(seq_len, embed_dim):
    """Kernel over a packed block of BB sequences: rows = BB*seq_len."""

    def kernel(x_ref, wconv_ref, bconv_ref, wout_ref, bout_ref, o_ref, x_pad_ref):
        # Lane-pad the (M, E) input block to (M, C_PAD) in VMEM.  Padding lanes
        # must be EXACT zeros: the lane-rolled tap packing below relies on it.
        x_pad_ref[...] = jnp.zeros(x_pad_ref.shape, jnp.float32)
        x_pad_ref[:, :embed_dim] = x_ref[...]
        x = x_pad_ref[...]                   # (M, C_PAD) f32 residual stream
        M = x.shape[0]

        w_taps = wconv_ref[...]              # (2*C_PAD, C_PAD) bf16: [prev|next , cur]
        b_conv = bconv_ref[...]              # (1, C_PAD) f32

        # Per-sequence boundary masks, hoisted out of the 5-layer loop.
        row = jax.lax.broadcasted_iota(jnp.int32, (M, C_PAD), 0)
        t_in_seq = row % seq_len
        is_first = t_in_seq == 0
        is_last = t_in_seq == (seq_len - 1)

        for _ in range(NUM_CONV_LAYERS):
            # Shifted copies along time with zero padding (Conv1d padding=1).
            # roll needs a non-negative shift: shift by M-1 == circular -1.
            x_prev = jnp.where(is_first, 0.0, pltpu.roll(x, shift=1, axis=0))
            x_next = jnp.where(is_last, 0.0, pltpu.roll(x, shift=M - 1, axis=0))
            # Pack prev (lanes 0..E-1) and next (lane-rolled to 64..64+E-1)
            # into a single 128-lane group: their non-zero lanes are disjoint,
            # so one add merges them and the conv contraction is K=256 not 384.
            packed = x_prev + pltpu.roll(x_next, shift=NEXT_LANE_OFF, axis=1)
            xin = jnp.concatenate(
                [packed.astype(jnp.bfloat16), x.astype(jnp.bfloat16)],
                axis=-1)                                         # (M, 2*C_PAD) bf16
            y = jnp.dot(xin, w_taps, preferred_element_type=jnp.float32) + b_conv
            # silu gate via EUP (exp + approx reciprocal); padding lanes stay 0
            # because y == 0 there (zero weights + zero bias) so y*gate == 0.
            gate = pl.reciprocal(1.0 + jnp.exp(-y), approx=True)
            x = y * gate + x                  # x = conv(x)*sigmoid(conv(x)) + x0  (f32)

        logits = jnp.dot(x.astype(jnp.bfloat16), wout_ref[...],
                         preferred_element_type=jnp.float32) + bout_ref[...]
        o_ref[...] = logits.astype(o_ref.dtype)   # bf16 writeback

    return kernel


def pack_tagger_weights(conv_w, conv_b, out_w, out_b, num_tags):
    """One-time weight packing (done at init, not per forward call)."""
    e = conv_w.shape[0]
    # torch Conv1d weight (Cout, Cin, 3) -> (k, Cin, Cout); tap 0 hits x[t-1],
    # tap 1 hits x[t], tap 2 hits x[t+1].
    w_kio = jnp.transpose(conv_w, (2, 1, 0))
    wconv = jnp.zeros((2, C_PAD, C_PAD), jnp.float32)
    wconv = wconv.at[0, :e, :e].set(w_kio[0])                                  # prev tap -> lanes 0..e-1
    wconv = wconv.at[0, NEXT_LANE_OFF:NEXT_LANE_OFF + e, :e].set(w_kio[2])     # next tap -> lanes 64..
    wconv = wconv.at[1, :e, :e].set(w_kio[1])                                  # cur tap  -> 2nd group
    wconv = wconv.reshape(2 * C_PAD, C_PAD).astype(jnp.bfloat16)
    bconv = jnp.zeros((1, C_PAD), jnp.float32).at[0, :e].set(conv_b)
    # torch Linear weight (num_tags, E) -> (E, num_tags)
    wout = jnp.zeros((C_PAD, K_PAD), jnp.float32).at[:e, :num_tags].set(out_w.T)
    wout = wout.astype(jnp.bfloat16)
    bout = jnp.zeros((1, K_PAD), jnp.float32).at[0, :num_tags].set(out_b)
    return wconv, bconv, wout, bout


def _choose_bb(B, T):
    """Sequences per block: M = BB*T rows, target ~<=1024, 8-aligned, grid>=2 if possible."""
    target_rows = 1024
    valid = [bb for bb in range(1, B + 1) if B % bb == 0 and (bb * T) % 8 == 0]
    if not valid:
        # TODO(synk): for very large ragged B*T this whole-batch fallback can
        # exceed scoped VMEM (notably v7x's 64 MiB); would need ragged-grid tiling.
        return B                              # full-dim block is always legal
    pref = [bb for bb in valid if bb * T <= target_rows and B // bb >= 2]
    if pref:
        return max(pref)                      # biggest block that still gives >=2 grid steps
    under = [bb for bb in valid if bb * T <= target_rows]
    return max(under) if under else min(valid)


def tagger_emissions(emb_x, packed_weights, num_tags):
    """emb_x: (B, T, EMBED_DIM) f32 -> logits (B, T, num_tags) f32."""
    B, T, E = emb_x.shape
    wconv, bconv, wout, bout = packed_weights

    x = emb_x.reshape(B * T, E)               # unpadded; lane-padding happens in-kernel

    BB = _choose_bb(B, T)                     # sequences per grid step
    M_BLK = BB * T
    grid = (B // BB,)

    cost = pl.CostEstimate(
        flops=2 * B * T * C_PAD * C_PAD * (2 * NUM_CONV_LAYERS + 1),
        transcendentals=2 * B * T * C_PAD * NUM_CONV_LAYERS,
        bytes_accessed=(B * T * E * 4 + B * T * K_PAD * 2
                        + wconv.size * 2 + wout.size * 2 + bconv.size * 4 + bout.size * 4),
    )

    logits_pad = pl.pallas_call(
        _make_emission_kernel(T, E),
        out_shape=jax.ShapeDtypeStruct((B * T, K_PAD), jnp.bfloat16),
        grid_spec=pltpu.PrefetchScalarGridSpec(
            num_scalar_prefetch=0,
            grid=grid,
            in_specs=[
                pl.BlockSpec((M_BLK, E), lambda i: (i, 0)),          # full last dim (50)
                pl.BlockSpec((2 * C_PAD, C_PAD), lambda i: (0, 0)),
                pl.BlockSpec((1, C_PAD), lambda i: (0, 0)),
                pl.BlockSpec((C_PAD, K_PAD), lambda i: (0, 0)),
                pl.BlockSpec((1, K_PAD), lambda i: (0, 0)),
            ],
            out_specs=pl.BlockSpec((M_BLK, K_PAD), lambda i: (i, 0)),
            scratch_shapes=[pltpu.VMEM((M_BLK, C_PAD), jnp.float32)],
        ),
        compiler_params=pltpu.CompilerParams(dimension_semantics=("parallel",)),
        cost_estimate=cost,
    )(x, wconv, bconv, wout, bout)

    return logits_pad[:, :num_tags].astype(jnp.float32).reshape(B, T, num_tags)


# ------------------------------- CRF (glue) -------------------------------- #
# TODO(synk): CRF log-likelihood / Viterbi is a sequential DP over tiny
# (num_tags x num_tags) matrices; kept in plain JAX (lax.scan), not Pallas.
def crf_log_likelihood(emissions, tags, start, end, trans):
    """torchcrf.CRF(emissions (T,B,K), tags (T,B)), full mask, reduction='sum'."""
    t0 = tags[0]
    num = start[t0] + jnp.take_along_axis(emissions[0], t0[:, None], axis=1)[:, 0]

    def num_step(carry, inp):
        prev_tag, score = carry
        emit_t, tag_t = inp
        score = (score + trans[prev_tag, tag_t]
                 + jnp.take_along_axis(emit_t, tag_t[:, None], axis=1)[:, 0])
        return (tag_t, score), None

    (_, num), _ = jax.lax.scan(num_step, (t0, num), (emissions[1:], tags[1:]))
    num = num + end[tags[-1]]

    alpha = start[None, :] + emissions[0]

    def den_step(alpha, emit_t):
        nxt = alpha[:, :, None] + trans[None, :, :] + emit_t[:, None, :]
        return jax.nn.logsumexp(nxt, axis=1), None

    alpha, _ = jax.lax.scan(den_step, alpha, emissions[1:])
    den = jax.nn.logsumexp(alpha + end[None, :], axis=1)
    return jnp.sum(num - den)


def crf_decode(emissions, start, end, trans):
    """Viterbi decode; returns (B, T) int32 best tag sequences (torch emits int64)."""
    score = start[None, :] + emissions[0]                       # (B, K)

    def step(score, emit_t):
        nxt = score[:, :, None] + trans[None, :, :] + emit_t[:, None, :]   # (B, K, K)
        return jnp.max(nxt, axis=1), jnp.argmax(nxt, axis=1)

    score, bps = jax.lax.scan(step, score, emissions[1:])       # bps: (T-1, B, K)
    score = score + end[None, :]
    last = jnp.argmax(score, axis=1)                            # (B,)

    def back(tag, bp_t):
        prev = jnp.take_along_axis(bp_t, tag[:, None], axis=1)[:, 0]
        return prev, prev

    _, prefix = jax.lax.scan(back, last, bps, reverse=True)     # tags for t = 0..T-2
    tags = jnp.concatenate([prefix, last[None, :]], axis=0)     # (T, B)
    return jnp.transpose(tags, (1, 0)).astype(jnp.int32)


# ---------------------------- full Tagger forward --------------------------- #
def tagger_forward(params, token_id, tag_id, training=False):
    emb = params["embed"][token_id]                             # (B, T, 50) gather (glue)
    logits = tagger_emissions(emb, params["packed"], params["num_tags"])
    emissions = jnp.transpose(logits, (1, 0, 2))                # torch transpose(0,1): (T, B, K)
    tags_tb = jnp.transpose(tag_id, (1, 0))                     # (T, B)
    if training:
        return -crf_log_likelihood(emissions, tags_tb,
                                   params["crf_start"], params["crf_end"], params["crf_trans"])
    return crf_decode(emissions, params["crf_start"], params["crf_end"], params["crf_trans"])


def init_params(key, num_tokens, num_tags):
    ks = jax.random.split(key, 7)
    e = EMBED_DIM
    conv_w = jax.random.normal(ks[1], (e, e, 3), jnp.float32) * (1.0 / (3 * e) ** 0.5)
    conv_b = jax.random.normal(ks[2], (e,), jnp.float32) * 0.01
    out_w = jax.random.normal(ks[3], (num_tags, e), jnp.float32) * (1.0 / e ** 0.5)
    out_b = jnp.zeros((num_tags,), jnp.float32)
    return dict(
        num_tags=num_tags,
        embed=jax.random.normal(ks[0], (num_tokens, e), jnp.float32),
        # Weights pre-packed / padded ONCE here, not on every forward call.
        packed=pack_tagger_weights(conv_w, conv_b, out_w, out_b, num_tags),
        crf_start=jax.random.uniform(ks[4], (num_tags,), jnp.float32, -0.1, 0.1),
        crf_end=jax.random.uniform(ks[5], (num_tags,), jnp.float32, -0.1, 0.1),
        crf_trans=jax.random.uniform(ks[6], (num_tags, num_tags), jnp.float32, -0.1, 0.1),
    )


if __name__ == "__main__":
    key = jax.random.PRNGKey(0)
    kp, kt, kg = jax.random.split(key, 3)
    num_tokens, num_tags, B, T = 100, 6, 2, 8
    params = init_params(kp, num_tokens, num_tags)
    token_id = jax.random.randint(kt, (B, T), 0, num_tokens, dtype=jnp.int32)
    tag_id = jax.random.randint(kg, (B, T), 0, num_tags, dtype=jnp.int32)

    decoded = tagger_forward(params, token_id, tag_id, training=False)   # (B, T) int32
    loss = tagger_forward(params, token_id, tag_id, training=True)       # scalar f32
    jax.block_until_ready((decoded, loss))
    print("KERNEL_OK")
</pallas_src>

<mosaic_0001>
module attributes {stable_mosaic.version = 11 : i64} {
  func.func @kernel(%arg0: i32, %arg1: memref<8x50xf32, #tpu.memory_space<vmem>>, %arg2: memref<256x128xbf16, #tpu.memory_space<vmem>>, %arg3: memref<1x128xf32, #tpu.memory_space<vmem>>, %arg4: memref<128x128xbf16, #tpu.memory_space<vmem>>, %arg5: memref<1x128xf32, #tpu.memory_space<vmem>>, %arg6: memref<8x128xbf16, #tpu.memory_space<vmem>>, %arg7: memref<8x128xf32, #tpu.memory_space<vmem>>) attributes {dimension_semantics = [#tpu.dimension_semantics<parallel>], iteration_bounds = array<i64: 2>, scalar_prefetch = 0 : i64, scratch_operands = 1 : i64, tpu.core_type = #tpu.core_type<tc>, window_params = [{transform_indices = @transform_0, window_bounds = array<i64: 8, 50>}, {pipeline_mode = #tpu.pipeline_mode<synchronous>, transform_indices = @transform_1, window_bounds = array<i64: 256, 128>}, {pipeline_mode = #tpu.pipeline_mode<synchronous>, transform_indices = @transform_2, window_bounds = array<i64: 1, 128>}, {pipeline_mode = #tpu.pipeline_mode<synchronous>, transform_indices = @transform_3, window_bounds = array<i64: 128, 128>}, {pipeline_mode = #tpu.pipeline_mode<synchronous>, transform_indices = @transform_4, window_bounds = array<i64: 1, 128>}, {transform_indices = @transform_5, window_bounds = array<i64: 8, 128>}]} {
    %cst = arith.constant 0.000000e+00 : f32
    %0 = vector.broadcast %cst : f32 to vector<8x128xf32>
    %c0 = arith.constant 0 : index
    %c0_0 = arith.constant 0 : index
    %1 = vector.load %arg7[%c0, %c0_0] : memref<8x128xf32, #tpu.memory_space<vmem>>, vector<8x128xf32>
    tpu.vector_store %arg7[%c0, %c0_0], %0 {strides = array<i32>} : memref<8x128xf32, #tpu.memory_space<vmem>>, vector<8x128xf32>,
    %c0_1 = arith.constant 0 : index
    %c0_2 = arith.constant 0 : index
    %2 = vector.load %arg1[%c0_1, %c0_2] : memref<8x50xf32, #tpu.memory_space<vmem>>, vector<8x50xf32>
    %c0_3 = arith.constant 0 : index
    %c0_4 = arith.constant 0 : index
    %3 = vector.load %arg7[%c0_3, %c0_4] : memref<8x128xf32, #tpu.memory_space<vmem>>, vector<8x50xf32>
    tpu.vector_store %arg7[%c0_3, %c0_4], %2 {strides = array<i32>} : memref<8x128xf32, #tpu.memory_space<vmem>>, vector<8x50xf32>,
    %c0_5 = arith.constant 0 : index
    %c0_6 = arith.constant 0 : index
    %4 = vector.load %arg7[%c0_5, %c0_6] : memref<8x128xf32, #tpu.memory_space<vmem>>, vector<8x128xf32>
    %c0_7 = arith.constant 0 : index
    %c0_8 = arith.constant 0 : index
    %5 = vector.load %arg2[%c0_7, %c0_8] : memref<256x128xbf16, #tpu.memory_space<vmem>>, vector<256x128xbf16>
    %c0_9 = arith.constant 0 : index
    %c0_10 = arith.constant 0 : index
    %6 = vector.load %arg3[%c0_9, %c0_10] : memref<1x128xf32, #tpu.memory_space<vmem>>, vector<1x128xf32>
    %7 = tpu.iota {dimensions = array<i32: 0>} : vector<8x128xi32>
    %c8_i32 = arith.constant 8 : i32
    %c0_i32 = arith.constant 0 : i32
    %8 = arith.cmpi eq, %c8_i32, %c0_i32 : i32
    %c1_i32 = arith.constant 1 : i32
    %9 = arith.select %8, %c1_i32, %c8_i32 : i32
    %10 = vector.broadcast %9 : i32 to vector<8x128xi32>
    %11 = arith.remsi %7, %10 : vector<8x128xi32>
    %c0_i32_11 = arith.constant 0 : i32
    %12 = vector.broadcast %c0_i32_11 : i32 to vector<8x128xi32>
    %13 = arith.cmpi ne, %11, %12 : vector<8x128xi32>
    %c0_i32_12 = arith.constant 0 : i32
    %14 = vector.broadcast %c0_i32_12 : i32 to vector<8x128xi32>
    %15 = arith.cmpi slt, %11, %14 : vector<8x128xi32>
    %c0_i32_13 = arith.constant 0 : i32
    %16 = arith.cmpi slt, %9, %c0_i32_13 : i32
    %17 = vector.broadcast %16 : i1 to vector<8x128xi1>
    %18 = vector.broadcast %17 : vector<8x128xi1> to vector<8x128xi1>
    %19 = arith.xori %15, %18 : vector<8x128xi1>
    %20 = arith.andi %19, %13 : vector<8x128xi1>
    %21 = vector.broadcast %9 : i32 to vector<8x128xi32>
    %22 = arith.addi %11, %21 : vector<8x128xi32>
    %23 = arith.select %20, %22, %11 : vector<8x128xi1>, vector<8x128xi32>
    %c0_i32_14 = arith.constant 0 : i32
    %24 = vector.broadcast %c0_i32_14 : i32 to vector<8x128xi32>
    %25 = arith.cmpi eq, %23, %24 : vector<8x128xi32>
    %c7_i32 = arith.constant 7 : i32
    %26 = vector.broadcast %c7_i32 : i32 to vector<8x128xi32>
    %27 = arith.cmpi eq, %23, %26 : vector<8x128xi32>
    %c1_i32_15 = arith.constant 1 : i32
    %28 = tpu.dynamic_rotate %4 by %c1_i32_15 dim 0 : vector<8x128xf32>, i32 -> vector<8x128xf32>
    %cst_16 = arith.constant 0.000000e+00 : f32
    %29 = vector.broadcast %cst_16 : f32 to vector<8x128xf32>
    %30 = arith.select %25, %29, %28 : vector<8x128xi1>, vector<8x128xf32>
    %c7_i32_17 = arith.constant 7 : i32
    %31 = tpu.dynamic_rotate %4 by %c7_i32_17 dim 0 : vector<8x128xf32>, i32 -> vector<8x128xf32>
    %cst_18 = arith.constant 0.000000e+00 : f32
    %32 = vector.broadcast %cst_18 : f32 to vector<8x128xf32>
    %33 = arith.select %27, %32, %31 : vector<8x128xi1>, vector<8x128xf32>
    %c64_i32 = arith.constant 64 : i32
    %34 = tpu.dynamic_rotate %33 by %c64_i32 dim 1 : vector<8x128xf32>, i32 -> vector<8x128xf32>
    %35 = arith.addf %30, %34 : vector<8x128xf32>
    %36 = arith.truncf %35 : vector<8x128xf32> to vector<8x128xbf16>
    %37 = arith.truncf %4 : vector<8x128xf32> to vector<8x128xbf16>
    %38 = tpu.concatenate %36, %37 in 1 : vector<8x128xbf16>, vector<8x128xbf16> -> vector<8x256xbf16>
    %cst_19 = arith.constant dense<0.000000e+00> : vector<8x128xf32>
    %39 = tpu.matmul %38, %5, %cst_19 {dimension_numbers = #tpu.dot_dimension_numbers<[1], [0], [0], [1], [0, 0, 1, 1], [], []>} : vector<8x256xbf16>, vector<256x128xbf16>, vector<8x128xf32> -> vector<8x128xf32>
    %40 = vector.broadcast %6 : vector<1x128xf32> to vector<8x128xf32>
    %41 = arith.addf %39, %40 : vector<8x128xf32>
    %cst_20 = arith.constant 0.000000e+00 : f32
    %42 = vector.broadcast %cst_20 : f32 to vector<8x128xf32>
    %43 = arith.subf %42, %41 : vector<8x128xf32>
    %44 = math.exp %43 : vector<8x128xf32>
    %cst_21 = arith.constant 1.000000e+00 : f32
    %45 = vector.broadcast %cst_21 : f32 to vector<8x128xf32>
    %46 = arith.addf %45, %44 : vector<8x128xf32>
    %47 = tpu.reciprocal %46 {approx = true} : vector<8x128xf32> -> vector<8x128xf32>
    %48 = arith.mulf %41, %47 : vector<8x128xf32>
    %49 = arith.addf %48, %4 : vector<8x128xf32>
    %c1_i32_22 = arith.constant 1 : i32
    %50 = tpu.dynamic_rotate %49 by %c1_i32_22 dim 0 : vector<8x128xf32>, i32 -> vector<8x128xf32>
    %cst_23 = arith.constant 0.000000e+00 : f32
    %51 = vector.broadcast %cst_23 : f32 to vector<8x128xf32>
    %52 = arith.select %25, %51, %50 : vector<8x128xi1>, vector<8x128xf32>
    %c7_i32_24 = arith.constant 7 : i32
    %53 = tpu.dynamic_rotate %49 by %c7_i32_24 dim 0 : vector<8x128xf32>, i32 -> vector<8x128xf32>
    %cst_25 = arith.constant 0.000000e+00 : f32
    %54 = vector.broadcast %cst_25 : f32 to vector<8x128xf32>
    %55 = arith.select %27, %54, %53 : vector<8x128xi1>, vector<8x128xf32>
    %c64_i32_26 = arith.constant 64 : i32
    %56 = tpu.dynamic_rotate %55 by %c64_i32_26 dim 1 : vector<8x128xf32>, i32 -> vector<8x128xf32>
    %57 = arith.addf %52, %56 : vector<8x128xf32>
    %58 = arith.truncf %57 : vector<8x128xf32> to vector<8x128xbf16>
    %59 = arith.truncf %49 : vector<8x128xf32> to vector<8x128xbf16>
    %60 = tpu.concatenate %58, %59 in 1 : vector<8x128xbf16>, vector<8x128xbf16> -> vector<8x256xbf16>
    %cst_27 = arith.constant dense<0.000000e+00> : vector<8x128xf32>
    %61 = tpu.matmul %60, %5, %cst_27 {dimension_numbers = #tpu.dot_dimension_numbers<[1], [0], [0], [1], [0, 0, 1, 1], [], []>} : vector<8x256xbf16>, vector<256x128xbf16>, vector<8x128xf32> -> vector<8x128xf32>
    %62 = vector.broadcast %6 : vector<1x128xf32> to vector<8x128xf32>
    %63 = arith.addf %61, %62 : vector<8x128xf32>
    %cst_28 = arith.constant 0.000000e+00 : f32
    %64 = vector.broadcast %cst_28 : f32 to vector<8x128xf32>
    %65 = arith.subf %64, %63 : vector<8x128xf32>
    %66 = math.exp %65 : vector<8x128xf32>
    %cst_29 = arith.constant 1.000000e+00 : f32
    %67 = vector.broadcast %cst_29 : f32 to vector<8x128xf32>
    %68 = arith.addf %67, %66 : vector<8x128xf32>
    %69 = tpu.reciprocal %68 {approx = true} : vector<8x128xf32> -> vector<8x128xf32>
    %70 = arith.mulf %63, %69 : vector<8x128xf32>
    %71 = arith.addf %70, %49 : vector<8x128xf32>
    %c1_i32_30 = arith.constant 1 : i32
    %72 = tpu.dynamic_rotate %71 by %c1_i32_30 dim 0 : vector<8x128xf32>, i32 -> vector<8x128xf32>
    %cst_31 = arith.constant 0.000000e+00 : f32
    %73 = vector.broadcast %cst_31 : f32 to vector<8x128xf32>
    %74 = arith.select %25, %73, %72 : vector<8x128xi1>, vector<8x128xf32>
    %c7_i32_32 = arith.constant 7 : i32
    %75 = tpu.dynamic_rotate %71 by %c7_i32_32 dim 0 : vector<8x128xf32>, i32 -> vector<8x128xf32>
    %cst_33 = arith.constant 0.000000e+00 : f32
    %76 = vector.broadcast %cst_33 : f32 to vector<8x128xf32>
    %77 = arith.select %27, %76, %75 : vector<8x128xi1>, vector<8x128xf32>
    %c64_i32_34 = arith.constant 64 : i32
    %78 = tpu.dynamic_rotate %77 by %c64_i32_34 dim 1 : vector<8x128xf32>, i32 -> vector<8x128xf32>
    %79 = arith.addf %74, %78 : vector<8x128xf32>
    %80 = arith.truncf %79 : vector<8x128xf32> to vector<8x128xbf16>
    %81 = arith.truncf %71 : vector<8x128xf32> to vector<8x128xbf16>
    %82 = tpu.concatenate %80, %81 in 1 : vector<8x128xbf16>, vector<8x128xbf16> -> vector<8x256xbf16>
    %cst_35 = arith.constant dense<0.000000e+00> : vector<8x128xf32>
    %83 = tpu.matmul %82, %5, %cst_35 {dimension_numbers = #tpu.dot_dimension_numbers<[1], [0], [0], [1], [0, 0, 1, 1], [], []>} : vector<8x256xbf16>, vector<256x128xbf16>, vector<8x128xf32> -> vector<8x128xf32>
    %84 = vector.broadcast %6 : vector<1x128xf32> to vector<8x128xf32>
    %85 = arith.addf %83, %84 : vector<8x128xf32>
    %cst_36 = arith.constant 0.000000e+00 : f32
    %86 = vector.broadcast %cst_36 : f32 to vector<8x128xf32>
    %87 = arith.subf %86, %85 : vector<8x128xf32>
    %88 = math.exp %87 : vector<8x128xf32>
    %cst_37 = arith.constant 1.000000e+00 : f32
    %89 = vector.broadcast %cst_37 : f32 to vector<8x128xf32>
    %90 = arith.addf %89, %88 : vector<8x128xf32>
    %91 = tpu.reciprocal %90 {approx = true} : vector<8x128xf32> -> vector<8x128xf32>
    %92 = arith.mulf %85, %91 : vector<8x128xf32>
    %93 = arith.addf %92, %71 : vector<8x128xf32>
    %c1_i32_38 = arith.constant 1 : i32
    %94 = tpu.dynamic_rotate %93 by %c1_i32_38 dim 0 : vector<8x128xf32>, i32 -> vector<8x128xf32>
    %cst_39 = arith.constant 0.000000e+00 : f32
    %95 = vector.broadcast %cst_39 : f32 to vector<8x128xf32>
    %96 = arith.select %25, %95, %94 : vector<8x128xi1>, vector<8x128xf32>
    %c7_i32_40 = arith.constant 7 : i32
    %97 = tpu.dynamic_rotate %93 by %c7_i32_40 dim 0 : vector<8x128xf32>, i32 -> vector<8x128xf32>
    %cst_41 = arith.constant 0.000000e+00 : f32
    %98 = vector.broadcast %cst_41 : f32 to vector<8x128xf32>
    %99 = arith.select %27, %98, %97 : vector<8x128xi1>, vector<8x128xf32>
    %c64_i32_42 = arith.constant 64 : i32
    %100 = tpu.dynamic_rotate %99 by %c64_i32_42 dim 1 : vector<8x128xf32>, i32 -> vector<8x128xf32>
    %101 = arith.addf %96, %100 : vector<8x128xf32>
    %102 = arith.truncf %101 : vector<8x128xf32> to vector<8x128xbf16>
    %103 = arith.truncf %93 : vector<8x128xf32> to vector<8x128xbf16>
    %104 = tpu.concatenate %102, %103 in 1 : vector<8x128xbf16>, vector<8x128xbf16> -> vector<8x256xbf16>
    %cst_43 = arith.constant dense<0.000000e+00> : vector<8x128xf32>
    %105 = tpu.matmul %104, %5, %cst_43 {dimension_numbers = #tpu.dot_dimension_numbers<[1], [0], [0], [1], [0, 0, 1, 1], [], []>} : vector<8x256xbf16>, vector<256x128xbf16>, vector<8x128xf32> -> vector<8x128xf32>
    %106 = vector.broadcast %6 : vector<1x128xf32> to vector<8x128xf32>
    %107 = arith.addf %105, %106 : vector<8x128xf32>
    %cst_44 = arith.constant 0.000000e+00 : f32
    %108 = vector.broadcast %cst_44 : f32 to vector<8x128xf32>
    %109 = arith.subf %108, %107 : vector<8x128xf32>
    %110 = math.exp %109 : vector<8x128xf32>
    %cst_45 = arith.constant 1.000000e+00 : f32
    %111 = vector.broadcast %cst_45 : f32 to vector<8x128xf32>
    %112 = arith.addf %111, %110 : vector<8x128xf32>
    %113 = tpu.reciprocal %112 {approx = true} : vector<8x128xf32> -> vector<8x128xf32>
    %114 = arith.mulf %107, %113 : vector<8x128xf32>
    %115 = arith.addf %114, %93 : vector<8x128xf32>
    %c1_i32_46 = arith.constant 1 : i32
    %116 = tpu.dynamic_rotate %115 by %c1_i32_46 dim 0 : vector<8x128xf32>, i32 -> vector<8x128xf32>
    %cst_47 = arith.constant 0.000000e+00 : f32
    %117 = vector.broadcast %cst_47 : f32 to vector<8x128xf32>
    %118 = arith.select %25, %117, %116 : vector<8x128xi1>, vector<8x128xf32>
    %c7_i32_48 = arith.constant 7 : i32
    %119 = tpu.dynamic_rotate %115 by %c7_i32_48 dim 0 : vector<8x128xf32>, i32 -> vector<8x128xf32>
    %cst_49 = arith.constant 0.000000e+00 : f32
    %120 = vector.broadcast %cst_49 : f32 to vector<8x128xf32>
    %121 = arith.select %27, %120, %119 : vector<8x128xi1>, vector<8x128xf32>
    %c64_i32_50 = arith.constant 64 : i32
    %122 = tpu.dynamic_rotate %121 by %c64_i32_50 dim 1 : vector<8x128xf32>, i32 -> vector<8x128xf32>
    %123 = arith.addf %118, %122 : vector<8x128xf32>
    %124 = arith.truncf %123 : vector<8x128xf32> to vector<8x128xbf16>
    %125 = arith.truncf %115 : vector<8x128xf32> to vector<8x128xbf16>
    %126 = tpu.concatenate %124, %125 in 1 : vector<8x128xbf16>, vector<8x128xbf16> -> vector<8x256xbf16>
    %cst_51 = arith.constant dense<0.000000e+00> : vector<8x128xf32>
    %127 = tpu.matmul %126, %5, %cst_51 {dimension_numbers = #tpu.dot_dimension_numbers<[1], [0], [0], [1], [0, 0, 1, 1], [], []>} : vector<8x256xbf16>, vector<256x128xbf16>, vector<8x128xf32> -> vector<8x128xf32>
    %128 = vector.broadcast %6 : vector<1x128xf32> to vector<8x128xf32>
    %129 = arith.addf %127, %128 : vector<8x128xf32>
    %cst_52 = arith.constant 0.000000e+00 : f32
    %130 = vector.broadcast %cst_52 : f32 to vector<8x128xf32>
    %131 = arith.subf %130, %129 : vector<8x128xf32>
    %132 = math.exp %131 : vector<8x128xf32>
    %cst_53 = arith.constant 1.000000e+00 : f32
    %133 = vector.broadcast %cst_53 : f32 to vector<8x128xf32>
    %134 = arith.addf %133, %132 : vector<8x128xf32>
    %135 = tpu.reciprocal %134 {approx = true} : vector<8x128xf32> -> vector<8x128xf32>
    %136 = arith.mulf %129, %135 : vector<8x128xf32>
    %137 = arith.addf %136, %115 : vector<8x128xf32>
    %138 = arith.truncf %137 : vector<8x128xf32> to vector<8x128xbf16>
    %c0_54 = arith.constant 0 : index
    %c0_55 = arith.constant 0 : index
    %139 = vector.load %arg4[%c0_54, %c0_55] : memref<128x128xbf16, #tpu.memory_space<vmem>>, vector<128x128xbf16>
    %cst_56 = arith.constant dense<0.000000e+00> : vector<8x128xf32>
    %140 = tpu.matmul %138, %139, %cst_56 {dimension_numbers = #tpu.dot_dimension_numbers<[1], [0], [0], [1], [0, 0, 1, 1], [], []>} : vector<8x128xbf16>, vector<128x128xbf16>, vector<8x128xf32> -> vector<8x128xf32>
    %c0_57 = arith.constant 0 : index
    %c0_58 = arith.constant 0 : index
    %141 = vector.load %arg5[%c0_57, %c0_58] : memref<1x128xf32, #tpu.memory_space<vmem>>, vector<1x128xf32>
    %142 = vector.broadcast %141 : vector<1x128xf32> to vector<8x128xf32>
    %143 = arith.addf %140, %142 : vector<8x128xf32>
    %144 = arith.truncf %143 : vector<8x128xf32> to vector<8x128xbf16>
    %c0_59 = arith.constant 0 : index
    %c0_60 = arith.constant 0 : index
    %145 = vector.load %arg6[%c0_59, %c0_60] : memref<8x128xbf16, #tpu.memory_space<vmem>>, vector<8x128xbf16>
    tpu.vector_store %arg6[%c0_59, %c0_60], %144 {strides = array<i32>} : memref<8x128xbf16, #tpu.memory_space<vmem>>, vector<8x128xbf16>,
    return
  }
  func.func @transform_0(%arg0: i32) -> (i32, i32) {
    %c0_i32 = arith.constant 0 : i32
    %c0_i32_0 = arith.constant 0 : i32
    return %arg0, %c0_i32 : i32, i32
  }
  func.func @transform_1(%arg0: i32) -> (i32, i32) {
    %c0_i32 = arith.constant 0 : i32
    %c0_i32_0 = arith.constant 0 : i32
    %c0_i32_1 = arith.constant 0 : i32
    return %c0_i32, %c0_i32_0 : i32, i32
  }
  func.func @transform_2(%arg0: i32) -> (i32, i32) {
    %c0_i32 = arith.constant 0 : i32
    %c0_i32_0 = arith.constant 0 : i32
    %c0_i32_1 = arith.constant 0 : i32
    return %c0_i32, %c0_i32_0 : i32, i32
  }
  func.func @transform_3(%arg0: i32) -> (i32, i32) {
    %c0_i32 = arith.constant 0 : i32
    %c0_i32_0 = arith.constant 0 : i32
    %c0_i32_1 = arith.constant 0 : i32
    return %c0_i32, %c0_i32_0 : i32, i32
  }
  func.func @transform_4(%arg0: i32) -> (i32, i32) {
    %c0_i32 = arith.constant 0 : i32
    %c0_i32_0 = arith.constant 0 : i32
    %c0_i32_1 = arith.constant 0 : i32
    return %c0_i32, %c0_i32_0 : i32, i32
  }
  func.func @transform_5(%arg0: i32) -> (i32, i32) {
    %c0_i32 = arith.constant 0 : i32
    %c0_i32_0 = arith.constant 0 : i32
    return %arg0, %c0_i32 : i32, i32
  }
}

</mosaic_0001>

<bundles_post_ra>
// kernel: tpu_custom_call.1
= control target key start
LH: loop header
LB: loop body
LE: loop exit
PB: predicated region body
PF: predicated region fallthrough
CT: control target
= control target key end

     0   :  { %10 = vsyncpa [#allocation4], 0  ;;  %s1822_s0 = inlined_call_operand.hbm [shape: f32[16,50], index: 0, kind: input, shape index: {}]   ;;  %s1823_s1 = inlined_call_operand.hbm [shape: bf16[256,128], index: 1, kind: input, shape index: {}]   ;;  %s1824_s2 = inlined_call_operand.vmem [shape: f32[1,128], index: 2, kind: input, shape index: {}]   ;;  %s1825_s3 = inlined_call_operand.hbm [shape: bf16[128,128], index: 3, kind: input, shape index: {}]   ;;  %s1826_s4 = inlined_call_operand.vmem [shape: f32[1,128], index: 4, kind: input, shape index: {}]   ;;  %s1827_s5 = inlined_call_operand.hbm [shape: bf16[16,128], index: 5, kind: output, shape index: {}]  }
   0x1   :  { %12 = vsyncpa [#allocation4 + $0x1], 0 }
   0x2   :  { %13 = vsyncpa [#allocation7], 0 }
   0x3   :  { %14 = vsyncpa [#allocation5], 0 }
   0x4   :  { %16 = vsyncpa [#allocation5 + $0x1], 0  ;;  %s1417_s18 = smov 0   ;;  %s1419_s19 = smov 0  }
   0x5   :  { %s1421_s20 = smov 0   ;;  %s1423_s21 = smov 0  }
   0x6 LB: > { %s1438_s22 = sadd.s32 4294967295, %s1376_s21   ;;  %s923_s23 = sadd.s32 4294967294, %s1376_s21   ;;  %s1376_s21 = sphi %s1423_s21, %s1851_s21   ;;  %s1372_s20 = sphi %s1421_s20, %s1850_s20   ;;  %s1368_s19 = sphi %s1419_s19, %s1849_s19   ;;  %s1364_s18 = sphi %s1417_s18, %s1848_s18  }
   0x7   : > { %p42_p0 = scmp.ne.s32.totalorder %s1368_s19, %s1364_s18  ;;  %p1828_p1 = scmp.eq.s32.totalorder %s1438_s22, 0 }
   0x8   : > { %p156_p3 = scmp.eq.s32.totalorder %s923_s23, 1  ;;  %p924_p5 = scmp.ge.s32.totalorder %s1376_s21, 1 }
   0x9   : > { %p1447_p4 = por %p1828_p1, %p42_p0  ;;  %p163_p7 = scmp.lt.s32.totalorder %s1376_s21, 3 }
   0xa   : > { %p1452_p6 = por %p156_p3, %p42_p0  ;;  %s1378_s27 = smov [#allocation6]  }
   0xb   : > { %s1831_s24 = scalar_select %p1447_p4, 1, 0 }
   0xc   : > { %s1832_s25 = scalar_select %p1452_p6, 1, 0 }
   0xd   : > { %p1457_p8 = pnand %p924_p5, %p163_p7  ;;  %s175_s28 = sshll.u32 %s1378_s27, 4  ;;  %s1461_s28 = int_to_ptr.vmem [resolvable:$true] %s175_s28 }
   0xe   : > { %s1379_s30 = smov [#allocation8]   ;;  %s1220_s9 = scalar_lea.hbm %s1823_s1, 2048 }
   0xf   : > { %p1116_p9 = pneg %p1457_p8  ;;  %s191_s6 = sshll.u32 %s1379_s30, 4  ;;  %s1472_s6 = int_to_ptr.vmem [resolvable:$true] %s191_s6 }
  0x10   : > { %p1221_p12 = scmp.ne.s32.totalorder %s1823_s1, %s1220_s9  ;;  %p1227_p5 = scmp.lt.u32.totalorder %s1220_s9, %s1823_s1 }
  0x11   : > { %p1468_p11 = pnand %p1116_p9, %p1828_p1 }
  0x13   : > { %p1222_p13 = pneg %p1468_p11 }
  0x15   : > { %p1223_p0 = pnand %p1222_p13, %p1221_p12 }
  0x17   : > { %p1224_p3 = pneg %p1223_p0 }
  0x19   : > { %p1229_p7 = pnand %p1227_p5, %p1224_p3 }
  0x1b   : > { %1232 = shalt.err (!%p1229_p7)
}
  0x1c   : > { %s1233_s14 = scalar_lea.vmem %s1461_s28, 2048  ;;  %p1241_p2 = scmp.lt.s32.totalorder %s1461_s28, %s1461_s28 }
  0x1d   : > { %p1234_p9 = scmp.ne.s32.totalorder %s1461_s28, %s1233_s14  ;;  %p1242_p12 = scmp.lt.s32.totalorder %s1233_s14, %s1233_s14 }
  0x1f   : > { %p1236_p10 = pnand %p1234_p9, %p1222_p13  ;;  %p1243_p0 = por %p1242_p12, %p1241_p2 }
  0x21   : > { %p1237_p1 = pneg %p1236_p10 }
  0x23   : > { %p1244_p6 = pnand %p1243_p0, %p1237_p1 }
  0x25   : > { %1247 = shalt.err (!%p1244_p6)
}
  0x26   : > { %s1380_s15 = smov 64   ;;  %s1381_s16 = smov 4  }
  0x27   : > { %1119 = dma.hbm_to_vmem [thread:$0]  (!%p1468_p11), %s1823_s1, 2048, %s1461_s28, [#allocation7], %s1380_s15, %s1380_s15, %s1381_s16  }
  0x28   : > { %s1248_s7 = scalar_lea.hbm %s1825_s3, 1024 }
  0x29   : > { %p1249_p2 = scmp.ne.s32.totalorder %s1825_s3, %s1248_s7  ;;  %p1255_p10 = scmp.lt.u32.totalorder %s1248_s7, %s1825_s3 }
  0x2b   : > { %p1251_p1 = pnand %p1249_p2, %p1222_p13 }
  0x2d   : > { %p1252_p6 = pneg %p1251_p1 }
  0x2f   : > { %p1257_p3 = pnand %p1255_p10, %p1252_p6 }
  0x31   : > { %1260 = shalt.err (!%p1257_p3)
}
  0x32   : > { %s1261_s28 = scalar_lea.vmem %s1472_s6, 1024  ;;  %p1269_p12 = scmp.lt.s32.totalorder %s1472_s6, %s1472_s6 }
  0x33   : > { %p1262_p5 = scmp.ne.s32.totalorder %s1472_s6, %s1261_s28  ;;  %p1270_p0 = scmp.lt.s32.totalorder %s1261_s28, %s1261_s28 }
  0x35   : > { %p1264_p7 = pnand %p1262_p5, %p1222_p13  ;;  %p1271_p2 = por %p1270_p0, %p1269_p12 }
  0x37   : > { %p1265_p9 = pneg %p1264_p7 }
  0x39   : > { %p1272_p1 = pnand %p1271_p2, %p1265_p9 }
  0x3b   : > { %1275 = shalt.err (!%p1272_p1)
}
  0x3c   : > { %1122 = dma.hbm_to_vmem [thread:$0]  (!%p1468_p11), %s1825_s3, 1024, %s1472_s6, [#allocation7], %s1380_s15, %s1380_s15, %s1381_s16  }
  0x3d   : > { %s1527_s14 = sadd.s32 1, %s1376_s21   ;;  %s29_s29 = sadd.s32 1, %s1372_s20 }
  0x3e   : > { %s26_s17 = ssub.s32 %s1376_s21, %s1527_s14  ;;  %p36_p13 = scmp.ne.s32.totalorder %s1372_s20, %s1368_s19 }
  0x3f   : > { %p27_p6 = scmp.eq.s32.totalorder %s26_s17, 0  ;;  %p37_p10 = scmp.eq.s32.totalorder %s1376_s21, 0 }
  0x40   : > { %p1835_p3 = scmp.eq.s32.totalorder %s1438_s22, 1  ;;  %p1133_p7 = scmp.lt.s32.totalorder %s1376_s21, 2 }
  0x41   : > { %s1543_s27 = scalar_select %p27_p6, %s1372_s20, %s29_s29  }
  0x42   : > { %p1537_p5 = por %p1835_p3, %p36_p13  ;;  %p38_p9 = por %p37_p10, %p36_p13 }
  0x43   : > { %s208_s30 = sand.u32 1, %s1372_s20   ;;  %s929_s6 = sshll.u32 %s1376_s21, 7 }
  0x44   : > { %s1836_s23 = scalar_select %p1537_p5, 1, 0 }
  0x45   : > { %s928_s7 = sshll.u32 %s208_s30, 3  ;;  %s1550_s8 = scalar_lea.hbm %s1822_s0, %s929_s6 }
  0x46   : > { %s212_s9 = scalar_lea.vmem [#allocation3], %s928_s7  ;;  %p1554_p11 = pnand %p1133_p7, %p38_p9 }
  0x47   : > { %s219_s10 = sshll.u32 %s212_s9, 4  ;;  %s209_s28 = scalar_lea.sflag [#allocation4], %s208_s30  ;;  %s1552_s10 = int_to_ptr.vmem [resolvable:$true] %s219_s10 }
  0x48   : > { %s1276_s12 = scalar_lea.hbm %s1550_s8, 128  ;;  %p1278_p0 = pneg %p1554_p11 }
  0x49   : > { %p1277_p12 = scmp.ne.s32.totalorder %s1550_s8, %s1276_s12  ;;  %s1281_s17 = scalar_lea.hbm %s1822_s0, 256 }
  0x4a   : > { %p1282_p13 = scmp.lt.u32.totalorder %s1550_s8, %s1822_s0  ;;  %p1283_p6 = scmp.lt.u32.totalorder %s1281_s17, %s1276_s12 }
  0x4b   : > { %p1279_p2 = pnand %p1278_p0, %p1277_p12  ;;  %p1285_p3 = scmp.lt.u32.totalorder %s1276_s12, %s1550_s8 }
  0x4c   : > { %p1284_p10 = por %p1283_p6, %p1282_p13 }
  0x4d   : > { %p1280_p1 = pneg %p1279_p2 }
  0x4e   : > { %p1286_p7 = por %p1285_p3, %p1284_p10 }
  0x50   : > { %p1287_p9 = pnand %p1286_p7, %p1280_p1 }
  0x52   : > { %1290 = shalt.err (!%p1287_p9)
}
  0x53   : > { %s1291_s30 = scalar_lea.vmem %s1552_s10, 128  ;;  %s1382_s15 = smov [#allocation3]  }
  0x54   : > { %p1292_p12 = scmp.ne.s32.totalorder %s1552_s10, %s1291_s30  ;;  %s1296_s16 = sshll.u32 %s1382_s15, 4  ;;  %s1297_s16 = int_to_ptr.vmem [resolvable:$false] %s1296_s16 }
  0x55   : > { %s1298_s9 = scalar_lea.vmem %s1297_s16, 256  ;;  %p1299_p4 = scmp.lt.s32.totalorder %s1552_s10, %s1297_s16 }
  0x56   : > { %p1294_p2 = pnand %p1292_p12, %p1278_p0  ;;  %p1300_p13 = scmp.lt.s32.totalorder %s1298_s9, %s1291_s30 }
  0x58   : > { %p1295_p5 = pneg %p1294_p2  ;;  %p1301_p6 = por %p1300_p13, %p1299_p4 }
  0x5a   : > { %p1302_p10 = pnand %p1301_p6, %p1295_p5 }
  0x5c   : > { %1305 = shalt.err (!%p1302_p10)
}
  0x5d   : > { %1126 = dma.hbm_to_vmem [thread:$0]  (!%p1554_p11), %s1550_s8, 128, %s1552_s10, %s209_s28  }
  0x5e   : > { %228 = sbr.rel (%p1457_p8) target bundleno = 2202 (0x89a), region = 40  ;;  %s1586_s12 = sand.u32 (!%p1457_p8), 1, %s1368_s19  }
  0x5f   : > { %s931_s13 = sshll.u32 (!%p1457_p8), %s1586_s12, 3  ;;  %s231_s29 = scalar_lea.sflag (!%p1457_p8), [#allocation4], %s1586_s12 }
  0x60   : > { %s234_s17 = scalar_lea.vmem (!%p1457_p8), [#allocation3], %s931_s13  ;;  %p1838_p4 = scmp.ne.s32.totalorder (!%p1457_p8), %s1831_s24, 0 }
  0x65   : > { %1351 = dma.done.wait (%p1838_p4), %s231_s29, 128  }
  0x66   : > { %1353 = vsyncadd (%p1838_p4), %s231_s29, 4294967168  ;;  %p1839_p5 = scmp.eq.s32.totalorder %s1438_s22, 0 }
  0x68   : > { %1355 = dma.done.wait (%p1839_p5), [#allocation7], 3072   ;;  %p1840_p11 = pmov %p1839_p5 }
  0x69   : > { %v1383_v0 = vmov 0.0   ;;  %v308_v1 = vlaneseq  ;;  %vm272_vm0 = vcmask 408576   ;;  %v271_v2 = vld [vmem:[%s234_s17] sm:$0xff]  ;;  %v1599_v4 = vld [vmem:[#allocation6 + $0x40] sm:$0xff]   ;;  %v1604_v6 = vld [vmem:[#allocation6 + $0x48] sm:$0xff]   ;;  %s1384_s24 = smov 64  }
  0x6a   : > { %1357 = vsyncadd (%p1840_p11), [#allocation7], 4294964224  ;;  %270 = vst [vmem:[#allocation2] sm:$0xff] %v1383_v0  ;;  %v1601_v5 = vld [vmem:[#allocation6] sm:$0xff]   ;;  %965 = vmatprep.subr.bf16.mxu0 %v1599_v4  ;;  %987 = vmatprep.subr.bf16.mxu1 %v1599_v4  ;;  %v1608_v8 = vld [vmem:[#allocation6 + $0x8] sm:$0xff]   ;;  %vm1385_vm3 = vmmov 0  }
  0x6b   : > { %v309_v3 = vshrl.u32 %v308_v1, 7  ;;  %273 = vst.msk [vmem:[#allocation2] sm:$0xff] %vm272_vm0, %v271_v2  ;;  %966 = vmatpush3.bf16.msra.mxu0 %v1601_v5  ;;  %988 = vmatpush3.bf16.msra.mxu1 %v1601_v5  ;;  %v1612_v9 = vld [vmem:[#allocation6 + $0x50] sm:$0xff]   ;;  %v1627_v14 = vld [vmem:[#allocation6 + $0x58] sm:$0xff]   ;;  %v1639_v18 = vld [vmem:[#allocation6 + $0x60] sm:$0xff]   ;;  %s934_s10 = sshll.u32 %s1586_s12, 2 }
  0x6c   : > { %967 = vmatprep.subr.bf16.mxu0 %v1604_v6  ;;  %989 = vmatprep.subr.bf16.mxu1 %v1604_v6  ;;  %v1622_v12 = vld [vmem:[#allocation6 + $0x10] sm:$0xff]   ;;  %v1636_v17 = vld [vmem:[#allocation6 + $0x18] sm:$0xff]   ;;  %v1643_v19 = vld [vmem:[#allocation6 + $0x20] sm:$0xff]   ;;  %s962_s7 = sshll.u32 %s1438_s22, 6  ;;  %s268_s6 = scalar_lea.vmem [#allocation9], %s934_s10 }
  0x6d   : > { %v314_v7 = vand.u32 7, %v309_v3  ;;  %v1646_v20 = vld [vmem:[#allocation6 + $0x68] sm:$0xff]   ;;  %v1653_v22 = vld [vmem:[#allocation6 + $0x70] sm:$0xff]   ;;  %v1663_v24 = vld [vmem:[#allocation6 + $0x78] sm:$0xff]   ;;  %s834_s30 = sshll.u32 %s268_s6, 4  ;;  %s1778_s9 = scalar_lea.hbm %s1827_s5, %s962_s7  ;;  %s1780_s30 = int_to_ptr.vmem [resolvable:$true] %s834_s30 }
  0x6e   : > { %v1650_v21 = vld [vmem:[#allocation6 + $0x28] sm:$0xff]   ;;  %v1660_v23 = vld [vmem:[#allocation6 + $0x30] sm:$0xff]   ;;  %v1668_v25 = vld [vmem:[#allocation6 + $0x38] sm:$0xff]   ;;  %s821_s13 = scalar_lea.sflag [#allocation5], %s1586_s12  ;;  %s1306_s22 = scalar_lea.vmem %s1780_s30, 64 }
  0x6f   : > { %vm1617_vm1 = vcmp.eq.s32.totalorder %v314_v7, 7  ;;  %968 = vmatpush3.bf16.msra.mxu0 %v1608_v8  ;;  %990 = vmatpush3.bf16.msra.mxu1 %v1608_v8  ;;  %vm1678_vm2 = vcmp.eq.s32.totalorder %v314_v7, 0  ;;  %v1703_v33 = vld [vmem:[%s1824_s2] ss:$0 sm:$0xff]  ;;  %v1194_v11 = vld [vmem:[#allocation8 + $0x10] sm:$0xff]   ;;  %v1196_v27 = vld [vmem:[#allocation8 + $0x20] sm:$0xff]   ;;  %p1307_p8 = scmp.ne.s32.totalorder %s1780_s30, %s1306_s22 }
  0x70   : > { %969 = vmatprep.subr.bf16.mxu0 %v1612_v9  ;;  %991 = vmatprep.subr.bf16.mxu1 %v1612_v9  ;;  %p1845_p0 = scmp.ne.s32.totalorder %s1836_s23, 0  ;;  %s1386_s29 = smov [#allocation9]  }
  0x71   : > { %s1310_s17 = sshll.u32 %s1386_s29, 4  ;;  %s1311_s17 = int_to_ptr.vmem [resolvable:$false] %s1310_s17 }
  0x72   : > { %v1615_v10 = vld [vmem:[#allocation2] sm:$0xff]  ;;  %p1308_p1 = pnand %p1307_p8, %p1845_p0  ;;  %p1313_p7 = scmp.lt.s32.totalorder %s1780_s30, %s1311_s17 }
  0x73   : > { %v326_v13 = vrot.slane %v1615_v10, 1  ;;  %v332_v15 = vpack.c.bf16 %v1615_v10, %v1615_v10  ;;  %970 = vmatpush3.bf16.msra.mxu0 %v1622_v12  ;;  %992 = vmatpush3.bf16.msra.mxu1 %v1622_v12  ;;  %v324_v26 = vrot.slane %v1615_v10, 7 }
  0x74   : > { %971 = vmatprep.subr.bf16.mxu0 %v1627_v14  ;;  %993 = vmatprep.subr.bf16.mxu1 %v1627_v14  ;;  %p1309_p3 = pneg %p1308_p1 }
  0x75   : > { %v327_v16 = vsel %vm1617_vm1, 0.0, %v326_v13  ;;  %467 = vmatprep.mubr.bf16.mxu0 %v332_v15  ;;  %v325_v28 = vsel %vm1678_vm2, 0.0, %v324_v26 }
  0x76   : > { %328 = vrot.lane.b32.xlu0 %v327_v16, %s1384_s24 }
  0x77   : > { %972 = vmatpush3.bf16.msra.mxu0 %v1636_v17  ;;  %994 = vmatpush3.bf16.msra.mxu1 %v1636_v17 }
  0x78   : > { %973 = vmatprep.subr.bf16.mxu0 %v1639_v18  ;;  %995 = vmatprep.subr.bf16.mxu1 %v1639_v18 }
  0x7b   : > { %974 = vmatpush3.bf16.msra.mxu0 %v1643_v19  ;;  %996 = vmatpush3.bf16.msra.mxu1 %v1643_v19 }
  0x7c   : > { %975 = vmatprep.subr.bf16.mxu0 %v1646_v20  ;;  %997 = vmatprep.subr.bf16.mxu1 %v1646_v20 }
  0x7f   : > { %976 = vmatpush3.bf16.msra.mxu0 %v1650_v21  ;;  %998 = vmatpush3.bf16.msra.mxu1 %v1650_v21 }
  0x80   : > { %977 = vmatprep.subr.bf16.mxu0 %v1653_v22  ;;  %999 = vmatprep.subr.bf16.mxu1 %v1653_v22 }
  0x83   : > { %978 = vmatpush3.bf16.msra.mxu0 %v1660_v23  ;;  %1000 = vmatpush3.bf16.msra.mxu1 %v1660_v23 }
  0x84   : > { %979 = vmatprep.subr.bf16.mxu0 %v1663_v24  ;;  %1001 = vmatprep.subr.bf16.mxu1 %v1663_v24 }
  0x87   : > { %980 = vmatpush3.bf16.msra.mxu0 %v1668_v25  ;;  %1002 = vmatpush3.bf16.msra.mxu1 %v1668_v25 }
  0x88   : > { %1009 = vmatprep.subr.bf16.mxu0 %v1599_v4  ;;  %1031 = vmatprep.subr.bf16.mxu1 %v1599_v4 }
  0xe8   : > { %v329_v29 = vpop.permute.xlu0 %328 }
  0xe9   : > { %v330_v30 = vadd.f32 %v329_v29, %v325_v28 }
  0xeb   : > { %v331_v31 = vpack.c.bf16 %v330_v30, %v330_v30 }
  0xed   : > { %468 = vmatmul.mubr.bf16.vlgmr.msra.gmra.mrb[0].mxu0 %v331_v31 }
  0xee   : > { %1010 = vmatpush3.bf16.msra.mxu0 %v1601_v5 }
  0xef   : > { %1011 = vmatprep.subr.bf16.mxu0 %v1604_v6 }
  0xf2   : > { %1012 = vmatpush3.bf16.msra.mxu0 %v1608_v8 }
  0xf3   : > { %1013 = vmatprep.subr.bf16.mxu0 %v1612_v9 }
  0xf6   : > { %1014 = vmatpush3.bf16.msra.mxu0 %v1622_v12 }
  0xf7   : > { %1015 = vmatprep.subr.bf16.mxu0 %v1627_v14 }
  0xfa   : > { %1016 = vmatpush3.bf16.msra.mxu0 %v1636_v17 }
  0xfb   : > { %1017 = vmatprep.subr.bf16.mxu0 %v1639_v18 }
  0xfe   : > { %1018 = vmatpush3.bf16.msra.mxu0 %v1643_v19 }
  0xff   : > { %1019 = vmatprep.subr.bf16.mxu0 %v1646_v20 }
 0x102   : > { %1020 = vmatpush3.bf16.msra.mxu0 %v1650_v21 }
 0x103   : > { %1021 = vmatprep.subr.bf16.mxu0 %v1653_v22 }
 0x106   : > { %1022 = vmatpush3.bf16.msra.mxu0 %v1660_v23 }
 0x107   : > { %1023 = vmatprep.subr.bf16.mxu0 %v1663_v24 }
 0x10a   : > { %1024 = vmatpush3.bf16.msra.mxu0 %v1668_v25 }
 0x10b   : > { %1053 = vmatprep.subr.bf16.mxu0 %v1599_v4 }
 0x1c0   : > { %v981_v32 = vpop.f32.mrb[0].mxu0 }
 0x1c1   : > { %v982_v34 = vpop.f32.mrb[1].mxu0 }
 0x1c2   : > { %v983_v35 = vadd.f32 %v982_v34, %v981_v32  ;;  %v984_v36 = vpop.f32.mrb[2].mxu0 }
 0x1c3   : > { %v985_v37 = vpop.f32.mrb[3].mxu0 }
 0x1c4   : > { %v470_v38 = vadd.f32 %v983_v35, %v1703_v33 }
 0x1c6   : > { %v475_v39 = vsub.f32 0.0, %v470_v38 }
 0x1c8   : > { %v476_v40 = vmul.f32 1.442695, %v475_v39 }
 0x1ca   : > { %1200 = vpow2.f32 %v476_v40 }
 0x1d4   : > { %v1201_v41 = vpop.eup %1200 }
 0x1d5   : > { %v478_v42 = vadd.f32 1.0, %v1201_v41 }
 0x1d7   : > { %1202 = vrcp.f32 %v478_v42 }
 0x1e1   : > { %v1203_v43 = vpop.eup %1202 }
 0x1e2   : > { %v480_v44 = vmul.f32 %v1203_v43, %v470_v38 }
 0x1e4   : > { %v481_v45 = vadd.f32 %v480_v44, %v1615_v10 }
 0x1e6   : > { %v490_v46 = vpack.c.bf16 %v481_v45, %v481_v45  ;;  %v484_v47 = vrot.slane %v481_v45, 1  ;;  %v482_v49 = vrot.slane %v481_v45, 7 }
 0x1e8   : > { %523 = vmatprep.mubr.bf16.mxu1 %v490_v46  ;;  %v485_v48 = vsel %vm1617_vm1, 0.0, %v484_v47  ;;  %v483_v51 = vsel %vm1678_vm2, 0.0, %v482_v49 }
 0x1e9   : > { %486 = vrot.lane.b32.xlu0 %v485_v48, %s1384_s24 }
 0x25b   : > { %v487_v50 = vpop.permute.xlu0 %486 }
 0x25c   : > { %v488_v52 = vadd.f32 %v487_v50, %v483_v51 }
 0x25e   : > { %v489_v53 = vpack.c.bf16 %v488_v52, %v488_v52 }
 0x260   : > { %524 = vmatmul.mubr.bf16.vlgmr.msra.gmra.mrb[0].mxu1 %v489_v53 }
 0x261   : > { %1032 = vmatpush3.bf16.msra.mxu1 %v1601_v5 }
 0x262   : > { %1033 = vmatprep.subr.bf16.mxu1 %v1604_v6 }
 0x265   : > { %1034 = vmatpush3.bf16.msra.mxu1 %v1608_v8 }
 0x266   : > { %1035 = vmatprep.subr.bf16.mxu1 %v1612_v9 }
 0x269   : > { %1036 = vmatpush3.bf16.msra.mxu1 %v1622_v12 }
 0x26a   : > { %1037 = vmatprep.subr.bf16.mxu1 %v1627_v14 }
 0x26d   : > { %1038 = vmatpush3.bf16.msra.mxu1 %v1636_v17 }
 0x26e   : > { %1039 = vmatprep.subr.bf16.mxu1 %v1639_v18 }
 0x271   : > { %1040 = vmatpush3.bf16.msra.mxu1 %v1643_v19 }
 0x272   : > { %1041 = vmatprep.subr.bf16.mxu1 %v1646_v20 }
 0x275   : > { %1042 = vmatpush3.bf16.msra.mxu1 %v1650_v21 }
 0x276   : > { %1043 = vmatprep.subr.bf16.mxu1 %v1653_v22 }
 0x279   : > { %1044 = vmatpush3.bf16.msra.mxu1 %v1660_v23 }
 0x27a   : > { %1045 = vmatprep.subr.bf16.mxu1 %v1663_v24 }
 0x27d   : > { %1046 = vmatpush3.bf16.msra.mxu1 %v1668_v25 }
 0x27e   : > { %1084 = vmatprep.subr.bf16.mxu1 %v1383_v0 }
 0x333   : > { %v1003_v54 = vpop.f32.mrb[0].mxu1 }
 0x334   : > { %v1004_v55 = vpop.f32.mrb[1].mxu1 }
 0x335   : > { %v1005_v56 = vadd.f32 %v1004_v55, %v1003_v54  ;;  %v1006_v57 = vpop.f32.mrb[2].mxu1 }
 0x336   : > { %v1007_v58 = vpop.f32.mrb[3].mxu1  ;;  %v1192_v57 = vld [vmem:[#allocation8] sm:$0xff]  }
 0x337   : > { %v526_v59 = vadd.f32 %v1005_v56, %v1703_v33  ;;  %v1193_v58 = vld [vmem:[#allocation8 + $0x8] sm:$0xff]  }
 0x339   : > { %v531_v60 = vsub.f32 0.0, %v526_v59 }
 0x33b   : > { %v532_v61 = vmul.f32 1.442695, %v531_v60  ;;  %v1197_v60 = vld [vmem:[#allocation8 + $0x28] sm:$0xff]  }
 0x33d   : > { %1204 = vpow2.f32 %v532_v61  ;;  %v1198_v61 = vld [vmem:[#allocation8 + $0x30] sm:$0xff]  }
 0x347   : > { %v1205_v62 = vpop.eup %1204 }
 0x348   : > { %v534_v63 = vadd.f32 1.0, %v1205_v62  ;;  %v1199_v62 = vld [vmem:[#allocation8 + $0x38] sm:$0xff]  }
 0x34a   : > { %1206 = vrcp.f32 %v534_v63 }
 0x354   : > { %v1207_v1 = vpop.eup %1206 }
 0x355   : > { %v536_v2 = vmul.f32 %v1207_v1, %v526_v59  ;;  %v1195_v59 = vld [vmem:[#allocation8 + $0x18] sm:$0xff]  }
 0x357   : > { %v537_v3 = vadd.f32 %v536_v2, %v481_v45 }
 0x359   : > { %v546_v4 = vpack.c.bf16 %v537_v3, %v537_v3  ;;  %v540_v7 = vrot.slane %v537_v3, 1  ;;  %v538_v13 = vrot.slane %v537_v3, 7 }
 0x35b   : > { %579 = vmatprep.mubr.bf16.mxu0 %v546_v4  ;;  %v541_v10 = vsel %vm1617_vm1, 0.0, %v540_v7  ;;  %v539_v16 = vsel %vm1678_vm2, 0.0, %v538_v13 }
 0x35c   : > { %542 = vrot.lane.b32.xlu1 %v541_v10, %s1384_s24 }
 0x3ce   : > { %v543_v15 = vpop.permute.xlu1 %542 }
 0x3cf   : > { %v544_v26 = vadd.f32 %v543_v15, %v539_v16 }
 0x3d1   : > { %v545_v28 = vpack.c.bf16 %v544_v26, %v544_v26 }
 0x3d3   : > { %580 = vmatmul.mubr.bf16.vlgmr.msra.gmra.mrb[4].mxu0 %v545_v28 }
 0x3d4   : > { %1054 = vmatpush3.bf16.msra.mxu0 %v1601_v5 }
 0x3d5   : > { %1055 = vmatprep.subr.bf16.mxu0 %v1604_v6 }
 0x3d8   : > { %1056 = vmatpush3.bf16.msra.mxu0 %v1608_v8 }
 0x3d9   : > { %1057 = vmatprep.subr.bf16.mxu0 %v1612_v9 }
 0x3dc   : > { %1058 = vmatpush3.bf16.msra.mxu0 %v1622_v12 }
 0x3dd   : > { %1059 = vmatprep.subr.bf16.mxu0 %v1627_v14 }
 0x3e0   : > { %1060 = vmatpush3.bf16.msra.mxu0 %v1636_v17 }
 0x3e1   : > { %1061 = vmatprep.subr.bf16.mxu0 %v1639_v18 }
 0x3e4   : > { %1062 = vmatpush3.bf16.msra.mxu0 %v1643_v19 }
 0x3e5   : > { %1063 = vmatprep.subr.bf16.mxu0 %v1646_v20 }
 0x3e8   : > { %1064 = vmatpush3.bf16.msra.mxu0 %v1650_v21 }
 0x3e9   : > { %1065 = vmatprep.subr.bf16.mxu0 %v1653_v22 }
 0x3ec   : > { %1066 = vmatpush3.bf16.msra.mxu0 %v1660_v23 }
 0x3ed   : > { %1067 = vmatprep.subr.bf16.mxu0 %v1663_v24 }
 0x3f0   : > { %1068 = vmatpush3.bf16.msra.mxu0 %v1668_v25 }
 0x4a6   : > { %v1025_v5 = vpop.f32.mrb[4].mxu0 }
 0x4a7   : > { %v1026_v6 = vpop.f32.mrb[5].mxu0 }
 0x4a8   : > { %v1027_v8 = vadd.f32 %v1026_v6, %v1025_v5  ;;  %v1028_v9 = vpop.f32.mrb[6].mxu0 }
 0x4a9   : > { %v1029_v12 = vpop.f32.mrb[7].mxu0 }
 0x4aa   : > { %v582_v14 = vadd.f32 %v1027_v8, %v1703_v33 }
 0x4ac   : > { %v587_v17 = vsub.f32 0.0, %v582_v14 }
 0x4ae   : > { %v588_v18 = vmul.f32 1.442695, %v587_v17 }
 0x4b0   : > { %1208 = vpow2.f32 %v588_v18 }
 0x4ba   : > { %v1209_v19 = vpop.eup %1208 }
 0x4bb   : > { %v590_v20 = vadd.f32 1.0, %v1209_v19 }
 0x4bd   : > { %1210 = vrcp.f32 %v590_v20 }
 0x4c7   : > { %v1211_v21 = vpop.eup %1210 }
 0x4c8   : > { %v592_v22 = vmul.f32 %v1211_v21, %v582_v14 }
 0x4ca   : > { %v593_v23 = vadd.f32 %v592_v22, %v537_v3 }
 0x4cc   : > { %v602_v29 = vpack.c.bf16 %v593_v23, %v593_v23  ;;  %v596_v24 = vrot.slane %v593_v23, 1  ;;  %v594_v30 = vrot.slane %v593_v23, 7 }
 0x4ce   : > { %635 = vmatprep.mubr.bf16.mxu1 %v602_v29  ;;  %v597_v25 = vsel %vm1617_vm1, 0.0, %v596_v24  ;;  %v595_v32 = vsel %vm1678_vm2, 0.0, %v594_v30 }
 0x4cf   : > { %598 = vrot.lane.b32.xlu1 %v597_v25, %s1384_s24 }
 0x541   : > { %v599_v31 = vpop.permute.xlu1 %598 }
 0x542   : > { %v600_v34 = vadd.f32 %v599_v31, %v595_v32 }
 0x544   : > { %v601_v35 = vpack.c.bf16 %v600_v34, %v600_v34 }
 0x546   : > { %636 = vmatmul.mubr.bf16.vlgmr.msra.gmra.mrb[4].mxu1 %v601_v35 }
 0x547   : > { %1085 = vmatpush3.bf16.msra.mxu1 %v1192_v57  ;;  %1100 = vmatprep.mubr.msk.bf16.mxu1 %vm1385_vm3, %v1383_v0 }
 0x548   : > { %1086 = vmatprep.subr.bf16.mxu1 %v1383_v0 }
 0x54b   : > { %1087 = vmatpush3.bf16.msra.mxu1 %v1193_v58 }
 0x54c   : > { %1088 = vmatprep.subr.bf16.mxu1 %v1383_v0 }
 0x54f   : > { %1089 = vmatpush3.bf16.msra.mxu1 %v1194_v11 }
 0x550   : > { %1090 = vmatprep.subr.bf16.mxu1 %v1383_v0 }
 0x553   : > { %1091 = vmatpush3.bf16.msra.mxu1 %v1195_v59 }
 0x554   : > { %1092 = vmatprep.subr.bf16.mxu1 %v1383_v0 }
 0x557   : > { %1093 = vmatpush3.bf16.msra.mxu1 %v1196_v27 }
 0x558   : > { %1094 = vmatprep.subr.bf16.mxu1 %v1383_v0 }
 0x55b   : > { %1095 = vmatpush3.bf16.msra.mxu1 %v1197_v60 }
 0x55c   : > { %1096 = vmatprep.subr.bf16.mxu1 %v1383_v0 }
 0x55f   : > { %1097 = vmatpush3.bf16.msra.mxu1 %v1198_v61 }
 0x560   : > { %1098 = vmatprep.subr.bf16.mxu1 %v1383_v0  ;;  %v952_v0 = vld [vmem:[%s1826_s4] ss:$0 sm:$0xff] }
 0x563   : > { %1099 = vmatpush3.bf16.msra.mxu1 %v1199_v62 }
 0x619   : > { %v1047_v36 = vpop.f32.mrb[4].mxu1 }
 0x61a   : > { %v1048_v37 = vpop.f32.mrb[5].mxu1 }
 0x61b   : > { %v1049_v38 = vadd.f32 %v1048_v37, %v1047_v36  ;;  %v1050_v39 = vpop.f32.mrb[6].mxu1 }
 0x61c   : > { %v1051_v40 = vpop.f32.mrb[7].mxu1 }
 0x61d   : > { %v638_v41 = vadd.f32 %v1049_v38, %v1703_v33 }
 0x61f   : > { %v643_v42 = vsub.f32 0.0, %v638_v41 }
 0x621   : > { %v644_v43 = vmul.f32 1.442695, %v643_v42 }
 0x623   : > { %1212 = vpow2.f32 %v644_v43 }
 0x62d   : > { %v1213_v44 = vpop.eup %1212 }
 0x62e   : > { %v646_v45 = vadd.f32 1.0, %v1213_v44 }
 0x630   : > { %1214 = vrcp.f32 %v646_v45 }
 0x63a   : > { %v1215_v46 = vpop.eup %1214 }
 0x63b   : > { %v648_v47 = vmul.f32 %v1215_v46, %v638_v41 }
 0x63d   : > { %v649_v48 = vadd.f32 %v648_v47, %v593_v23 }
 0x63f   : > { %v658_v49 = vpack.c.bf16 %v649_v48, %v649_v48  ;;  %v652_v50 = vrot.slane %v649_v48, 1  ;;  %v650_v52 = vrot.slane %v649_v48, 7 }
 0x641   : > { %691 = vmatprep.mubr.bf16.mxu0 %v658_v49  ;;  %v653_v51 = vsel %vm1617_vm1, 0.0, %v652_v50  ;;  %v651_v54 = vsel %vm1678_vm2, 0.0, %v650_v52 }
 0x642   : > { %654 = vrot.lane.b32.xlu0 %v653_v51, %s1384_s24  ;;  %s1312_s24 = scalar_lea.vmem %s1311_s17, 128 }
 0x643   : > { %p1314_p9 = scmp.lt.s32.totalorder %s1312_s24, %s1306_s22 }
 0x645   : > { %p1315_p12 = por %p1314_p9, %p1313_p7 }
 0x647   : > { %p1316_p2 = pnand %p1315_p12, %p1309_p3 }
 0x6b4   : > { %v655_v53 = vpop.permute.xlu0 %654 }
 0x6b5   : > { %v656_v55 = vadd.f32 %v655_v53, %v651_v54 }
 0x6b7   : > { %v657_v56 = vpack.c.bf16 %v656_v55, %v656_v55 }
 0x6b9   : > { %692 = vmatmul.mubr.bf16.vlgmr.msra.gmra.mrb[8].mxu0 %v657_v56 }
 0x78c   : > { %v1069_v63 = vpop.f32.mrb[8].mxu0 }
 0x78d   : > { %v1070_v1 = vpop.f32.mrb[9].mxu0 }
 0x78e   : > { %v1071_v2 = vadd.f32 %v1070_v1, %v1069_v63  ;;  %v1072_v3 = vpop.f32.mrb[10].mxu0 }
 0x78f   : > { %v1073_v4 = vpop.f32.mrb[11].mxu0 }
 0x790   : > { %v694_v7 = vadd.f32 %v1071_v2, %v1703_v33 }
 0x792   : > { %v699_v10 = vsub.f32 0.0, %v694_v7 }
 0x794   : > { %v700_v13 = vmul.f32 1.442695, %v699_v10 }
 0x796   : > { %1216 = vpow2.f32 %v700_v13 }
 0x7a0   : > { %v1217_v15 = vpop.eup %1216 }
 0x7a1   : > { %v702_v16 = vadd.f32 1.0, %v1217_v15 }
 0x7a3   : > { %1218 = vrcp.f32 %v702_v16 }
 0x7ad   : > { %v1219_v26 = vpop.eup %1218 }
 0x7ae   : > { %v704_v28 = vmul.f32 %v1219_v26, %v694_v7 }
 0x7b0   : > { %v705_v5 = vadd.f32 %v704_v28, %v649_v48 }
 0x7b2   : > { %v706_v6 = vpack.c.bf16 %v705_v5, %v705_v5 }
 0x7b4   : > { %1101 = vmatmul.mubr.bf16.vlgmr.msra.gmra.mrb[8].mxu1 %v706_v6 }
 0x887   : > { %v812_v8 = vpop.f32.mrb[8].mxu1 }
 0x888   : > { %v813_v33 = vadd.f32 %v952_v0, %v812_v8  ;;  %v1102_v9 = vpop.f32.mrb[9].mxu1 }
 0x889   : > { %v815_v12 = vpop.f32.mrb[10].mxu1 }
 0x88a   : > { %v818_v14 = vpack.c.bf16 %v813_v33, %v813_v33  ;;  %v1103_v17 = vpop.f32.mrb[11].mxu1 }
 0x88c   : > { %819 = vst [vmem:[%s268_s6] sm:$0xf] %v818_v14 }
 0x88d   : > { %1319 = shalt.err (!%p1316_p2)
}
 0x88e   : > { %s1320_s12 = scalar_lea.hbm %s1778_s9, 64  ;;  %s1324_s10 = scalar_lea.hbm %s1827_s5, 128 }
 0x88f   : > { %p1321_p13 = scmp.ne.s32.totalorder %s1778_s9, %s1320_s12  ;;  %p1325_p4 = scmp.lt.u32.totalorder %s1778_s9, %s1827_s5 }
 0x890   : > { %p1326_p5 = scmp.lt.u32.totalorder %s1324_s10, %s1320_s12  ;;  %p1328_p8 = scmp.lt.u32.totalorder %s1320_s12, %s1778_s9 }
 0x891   : > { %p1322_p6 = pnand %p1321_p13, %p1845_p0 }
 0x892   : > { %p1327_p11 = por %p1326_p5, %p1325_p4 }
 0x893   : > { %p1323_p10 = pneg %p1322_p6 }
 0x894   : > { %p1329_p1 = por %p1328_p8, %p1327_p11 }
 0x896   : > { %p1330_p3 = pnand %p1329_p1, %p1323_p10 }
 0x898   : > { %1333 = shalt.err (!%p1330_p3)
}
 0x899   : > { %1114 = dma.vmem_to_hbm [thread:$0]  (%p1845_p0), %s1780_s30, 64, %s1778_s9, %s821_s13  }
 0x89a PF: > { %s846_s7 = sand.u32 1, %s1364_s18   ;;  %p1846_p7 = scmp.ne.s32.totalorder %s1832_s25, 0 }
 0x89b   : > { %p1847_p9 = scmp.ge.s32.totalorder %s1376_s21, 2  ;;  %s847_s6 = scalar_lea.sflag [#allocation5], %s846_s7 }
 0x89d   : > { %p1128_p12 = pnand %p1847_p9, %p1846_p7 }
 0x89f   : > { %1359 = dma.done.wait (!%p1128_p12), %s847_s6, 64  }
 0x8a0   : > { %1361 = vsyncadd (!%p1128_p12), %s847_s6, 4294967232  ;;  %p19_p2 = scmp.ge.s32.totalorder %s1527_s14, 4   ;;  %s1848_s18 = smov %s1368_s19 }
 0x8a1   : > { %s1849_s19 = smov %s1372_s20  ;;  %s1850_s20 = smov %s1543_s27 }
 0x8a2   : > { %s1851_s21 = smov %s1527_s14  ;;  %21 = sbr.rel (!%p19_p2) target bundleno = 6 (0x6), region = 93 }
 0x8a9   :  { %852 = vsyncpa [#allocation4], 1 }
 0x8aa   :  { %854 = vsyncpa [#allocation4 + $0x1], 1 }
 0x8ab   :  { %855 = vsyncpa [#allocation7], 1 }
 0x8ac   :  { %856 = vsyncpa [#allocation5], 1 }
 0x8ad   :  { %858 = vsyncpa [#allocation5 + $0x1], 1 }

</bundles_post_ra>
